<compile_context>
chip_gen: v7x
topology: tpu7x:2x2x1
jax: 0.10.0
libtpu: 0.0.40
codegen_flags: <defaults>
</compile_context>

<pallas_src>
import jax
import jax.numpy as jnp
from jax.experimental import pallas as pl
from jax.experimental.pallas import tpu as pltpu


def _add_prompt_kernel(x_ref, prompt_ref, o_ref):
    # x_ref: (TB, F), prompt_ref: (1, F).  Sublane-broadcast add; one full-tile
    # load per input and one unmasked full-tile store.  Pure VPU / DMA work.
    o_ref[...] = x_ref[...] + prompt_ref[...]


def _pick_batch_tile(batch, flat, bytes_per_elem=4, per_tile_budget=3 << 20):
    """Largest batch tile (multiple of 8, dividing batch) with tile <= ~3 MiB.

    Double-buffered input tile + double-buffered output tile ~= 4x tile bytes,
    so a 3 MiB tile keeps the pipeline around 12 MiB of VMEM — inside v5e's
    16 MiB default scoped limit and well under v6e (32 MiB) / v7x (32 MiB).
    Bigger tiles amortize the ~0.35 us per-grid-step overhead.
    """
    cap = max(8, per_tile_budget // max(1, flat * bytes_per_elem))
    for tb in (4096, 2048, 1024, 512, 256, 128, 64, 32, 16, 8):
        if tb <= cap and batch % tb == 0:
            return tb
    # Fall back to the full batch: a full-extent block is always layout-legal,
    # and this only triggers for small / odd batch sizes where VMEM is a non-issue.
    return batch


def bad_feature_prompter_forward(x, pad_up, pad_down, pad_left, pad_right, *,
                                 pad_size, image_size):
    """x: (B, 3, H, W) NCHW.  Returns x + broadcasted picture-frame prompt."""
    B, C, H, W = x.shape
    assert H == image_size and W == image_size and C == 3
    base_size = image_size - 2 * pad_size

    # --- assemble the frame prompt once (mirrors the torch.cat construction) ---
    base = jnp.zeros((1, C, base_size, base_size), x.dtype)
    prompt = jnp.concatenate([pad_left.astype(x.dtype), base,
                              pad_right.astype(x.dtype)], axis=3)
    prompt = jnp.concatenate([pad_up.astype(x.dtype), prompt,
                              pad_down.astype(x.dtype)], axis=2)  # (1, C, H, W)

    # --- lane-dense flatten: (B, F).  F = C*H*W = 768 -> multiple of 128 ---
    F = C * H * W
    x_flat = x.reshape(B, F)
    prompt_flat = prompt.reshape(1, F)

    TB = _pick_batch_tile(B, F, bytes_per_elem=x.dtype.itemsize)
    grid = (pl.cdiv(B, TB),)

    out_flat = pl.pallas_call(
        _add_prompt_kernel,
        out_shape=jax.ShapeDtypeStruct((B, F), x.dtype),
        grid=grid,
        in_specs=[
            pl.BlockSpec((TB, F), lambda b: (b, 0)),   # x tile (streamed from HBM)
            pl.BlockSpec((1, F), lambda b: (0, 0)),    # prompt (VMEM-resident)
        ],
        out_specs=pl.BlockSpec((TB, F), lambda b: (b, 0)),
        input_output_aliases={0: 0},                   # donate x's HBM buffer
        compiler_params=pltpu.CompilerParams(
            dimension_semantics=("parallel",)),
    )(x_flat, prompt_flat)

    return out_flat.reshape(B, C, H, W)


def _reference_forward(x, pad_up, pad_down, pad_left, pad_right, *,
                       pad_size, image_size):
    """Pure-JAX mirror of the PyTorch forward (is_backdoor=False)."""
    base_size = image_size - 2 * pad_size
    base = jnp.zeros((1, 3, base_size, base_size), x.dtype)
    prompt = jnp.concatenate([pad_left, base, pad_right], axis=3)
    prompt = jnp.concatenate([pad_up, prompt, pad_down], axis=2)
    prompt = jnp.concatenate([prompt] * x.shape[0], axis=0)
    return x + prompt


if __name__ == "__main__":
    # Small shapes consistent with the module: 3 channels, image_size=16, prompt_size=2.
    image_size = 16
    pad_size = 2
    base_size = image_size - 2 * pad_size
    B = 2

    key = jax.random.PRNGKey(0)
    kx, ku, kd, kl, kr = jax.random.split(key, 5)

    x = jax.random.normal(kx, (B, 3, image_size, image_size), jnp.float32)
    # Deterministic "randn" parameter init (shapes from __init__).
    pad_up = jax.random.normal(ku, (1, 3, pad_size, image_size), jnp.float32)
    pad_down = jax.random.normal(kd, (1, 3, pad_size, image_size), jnp.float32)
    pad_left = jax.random.normal(kl, (1, 3, base_size, pad_size), jnp.float32)
    pad_right = jax.random.normal(kr, (1, 3, base_size, pad_size), jnp.float32)

    out = bad_feature_prompter_forward(
        x, pad_up, pad_down, pad_left, pad_right,
        pad_size=pad_size, image_size=image_size)
    out = jax.block_until_ready(out)

    ref = _reference_forward(
        x, pad_up, pad_down, pad_left, pad_right,
        pad_size=pad_size, image_size=image_size)

    assert out.shape == (B, 3, image_size, image_size)
    assert jnp.allclose(out, ref, atol=1e-6, rtol=1e-6)
    print("KERNEL_OK")
</pallas_src>

<mosaic_0001>
module attributes {stable_mosaic.version = 11 : i64} {
  func.func @_add_prompt_kernel(%arg0: i32, %arg1: memref<2x768xf32, #tpu.memory_space<vmem>>, %arg2: memref<1x768xf32, #tpu.memory_space<vmem>>, %arg3: memref<2x768xf32, #tpu.memory_space<vmem>>) attributes {dimension_semantics = [#tpu.dimension_semantics<parallel>], iteration_bounds = array<i64: 1>, scalar_prefetch = 0 : i64, scratch_operands = 0 : i64, tpu.core_type = #tpu.core_type<tc>, window_params = [{transform_indices = @transform_0, window_bounds = array<i64: 2, 768>}, {pipeline_mode = #tpu.pipeline_mode<synchronous>, transform_indices = @transform_1, window_bounds = array<i64: 1, 768>}, {transform_indices = @transform_2, window_bounds = array<i64: 2, 768>}]} {
    %c0 = arith.constant 0 : index
    %c0_0 = arith.constant 0 : index
    %0 = vector.load %arg1[%c0, %c0_0] : memref<2x768xf32, #tpu.memory_space<vmem>>, vector<2x768xf32>
    %c0_1 = arith.constant 0 : index
    %c0_2 = arith.constant 0 : index
    %1 = vector.load %arg2[%c0_1, %c0_2] : memref<1x768xf32, #tpu.memory_space<vmem>>, vector<1x768xf32>
    %2 = vector.broadcast %1 : vector<1x768xf32> to vector<2x768xf32>
    %3 = arith.addf %0, %2 : vector<2x768xf32>
    %c0_3 = arith.constant 0 : index
    %c0_4 = arith.constant 0 : index
    %4 = vector.load %arg3[%c0_3, %c0_4] : memref<2x768xf32, #tpu.memory_space<vmem>>, vector<2x768xf32>
    tpu.vector_store %arg3[%c0_3, %c0_4], %3 {strides = array<i32>} : memref<2x768xf32, #tpu.memory_space<vmem>>, vector<2x768xf32>,
    return
  }
  func.func @transform_0(%arg0: i32) -> (i32, i32) {
    %c0_i32 = arith.constant 0 : i32
    %c0_i32_0 = arith.constant 0 : i32
    return %arg0, %c0_i32 : i32, i32
  }
  func.func @transform_1(%arg0: i32) -> (i32, i32) {
    %c0_i32 = arith.constant 0 : i32
    %c0_i32_0 = arith.constant 0 : i32
    %c0_i32_1 = arith.constant 0 : i32
    return %c0_i32, %c0_i32_0 : i32, i32
  }
  func.func @transform_2(%arg0: i32) -> (i32, i32) {
    %c0_i32 = arith.constant 0 : i32
    %c0_i32_0 = arith.constant 0 : i32
    return %arg0, %c0_i32 : i32, i32
  }
}

</mosaic_0001>

<bundles_post_ra>
// kernel: tpu_custom_call.1
= control target key start
LH: loop header
LB: loop body
LE: loop exit
PB: predicated region body
PF: predicated region fallthrough
CT: control target
= control target key end

     0   :  { %7 = vsyncpa [#allocation3], 0  ;;  %s194_s0 = inlined_call_operand.hbm [shape: f32[2,768], index: 0, kind: input, shape index: {}, may-alias: {0,2}]   ;;  %s195_s1 = inlined_call_operand.vmem [shape: f32[1,768], index: 1, kind: input, shape index: {}]   ;;  %s196_s2 = inlined_call_operand.hbm [shape: f32[2,768], index: 2, kind: output, shape index: {}, may-alias: {0,2}]  }
   0x1   :  { %8 = vsyncpa [#allocation4], 0  ;;  %s149_s9 = smov [#allocation2]   ;;  %s101_s13 = scalar_lea.hbm %s194_s0, 192 }
   0x2   :  { %s15_s10 = sshll.u32 %s149_s9, 4  ;;  %p102_p0 = scmp.ne.s32.totalorder %s194_s0, %s101_s13  ;;  %s16_s10 = int_to_ptr.vmem [resolvable:$true] %s15_s10 }
   0x3   :  { %p105_p1 = scmp.lt.u32.totalorder %s101_s13, %s194_s0 }
   0x5   :  { %p107_p2 = pnand %p105_p1, %p102_p0 }
   0x7   :  { %110 = shalt.err (!%p107_p2)
}
   0x8   :  { %s111_s18 = scalar_lea.vmem %s16_s10, 192  ;;  %p116_p4 = scmp.lt.s32.totalorder %s16_s10, %s16_s10 }
   0x9   :  { %p112_p3 = scmp.ne.s32.totalorder %s16_s10, %s111_s18  ;;  %p117_p5 = scmp.lt.s32.totalorder %s111_s18, %s111_s18 }
   0xb   :  { %p118_p6 = por %p117_p5, %p116_p4 }
   0xd   :  { %p119_p7 = pnand %p118_p6, %p112_p3 }
   0xf   :  { %122 = shalt.err (!%p119_p7)
}
  0x10   :  { %18 = dma.hbm_to_vmem [thread:$0]  %s194_s0, 192, %s16_s10, [#allocation3]  }
  0x11   :  { %145 = dma.done.wait [#allocation3], 192  }
  0x12   :  { %146 = vsyncadd [#allocation3], 4294967104  ;;  %v28_v0 = vlaneseq  ;;  %v150_v1 = vmov 1983009808   ;;  %v26_v11 = vld [vmem:[%s195_s1] sm:$0x3f] }
  0x13   :  { %v55_v2 = vunpack.c.l.s4 %v150_v1  ;;  %v25_v24 = vld [vmem:[#allocation2 + $0x8] sm:$0xf]  ;;  %v24_v25 = vld [vmem:[#allocation2] sm:$0xff]  ;;  %s151_s0 = smov [#allocation5]  }
  0x14   :  { %v29_v3 = vshrl.u32 %v28_v0, 7  ;;  %s89_s23 = sshll.u32 %s151_s0, 4  ;;  %s90_s23 = int_to_ptr.vmem [resolvable:$true] %s89_s23 }
  0x15   :  { %v56_v4 = vunpack.c.0.s8 %v55_v2  ;;  %s123_s1 = scalar_lea.vmem %s90_s23, 192  ;;  %p128_p9 = scmp.lt.s32.totalorder %s90_s23, %s90_s23 }
  0x16   :  { %v30_v5 = vsub.s32 0, %v29_v3  ;;  %v34_v6 = vsub.s32 1, %v29_v3  ;;  %v38_v7 = vsub.s32 2, %v29_v3  ;;  %v42_v8 = vsub.s32 3, %v29_v3  ;;  %p124_p8 = scmp.ne.s32.totalorder %s90_s23, %s123_s1  ;;  %p129_p10 = scmp.lt.s32.totalorder %s123_s1, %s123_s1 }
  0x17   :  { %v46_v9 = vsub.s32 4, %v29_v3  ;;  %v50_v10 = vsub.s32 5, %v29_v3  ;;  %v59_v12 = vsub.s32 %v56_v4, %v29_v3 }
  0x18   :  { %v31_v13 = vrot.slane %v26_v11, %v30_v5  ;;  %v35_v14 = vrot.slane %v26_v11, %v34_v6  ;;  %v39_v15 = vrot.slane %v26_v11, %v38_v7  ;;  %v43_v16 = vrot.slane %v26_v11, %v42_v8  ;;  %p130_p11 = por %p129_p10, %p128_p9 }
  0x19   :  { %v47_v17 = vrot.slane %v26_v11, %v46_v9  ;;  %v51_v18 = vrot.slane %v26_v11, %v50_v10 }
  0x1a   :  { %v52_v19 = vcombine.low %v31_v13, %v35_v14  ;;  %v53_v20 = vcombine.low %v39_v15, %v43_v16  ;;  %p131_p12 = pnand %p130_p11, %p124_p8 }
  0x1b   :  { %v69_v21 = vcombine.low %v47_v17, %v51_v18 }
  0x1c   :  { %v60_v22 = vrot.slane %v52_v19, %v59_v12  ;;  %v67_v23 = vrot.slane %v53_v20, %v59_v12 }
  0x1d   :  { %v76_v26 = vrot.slane %v69_v21, %v59_v12 }
  0x1e   :  { %v68_v27 = vcombine.low %v60_v22, %v67_v23 }
  0x1f   :  { %v80_v28 = vadd.f32 %v76_v26, %v25_v24 }
  0x20   :  { %v79_v29 = vadd.f32 %v68_v27, %v24_v25 }
  0x21   :  { %82 = vst [vmem:[#allocation5 + $0x8] sm:$0xf] %v80_v28 }
  0x22   :  { %81 = vst [vmem:[#allocation5] sm:$0xff] %v79_v29 }
  0x23   :  { %134 = shalt.err (!%p131_p12)
}
  0x24   :  { %s135_s26 = scalar_lea.hbm %s196_s2, 192 }
  0x25   :  { %p136_p13 = scmp.ne.s32.totalorder %s196_s2, %s135_s26  ;;  %p139_p0 = scmp.lt.u32.totalorder %s135_s26, %s196_s2 }
  0x27   :  { %p141_p1 = pnand %p139_p0, %p136_p13 }
  0x29   :  { %144 = shalt.err (!%p141_p1)
}
  0x2a   :  { %92 = dma.vmem_to_hbm [thread:$0]  %s90_s23, 192, %s196_s2, [#allocation4]  }
  0x2b   :  { %147 = dma.done.wait [#allocation4], 192  }
  0x2c   :  { %148 = vsyncadd [#allocation4], 4294967104 }
  0x2d   :  { %96 = vsyncpa [#allocation3], 1 }
  0x2e   :  { %97 = vsyncpa [#allocation4], 1 }

</bundles_post_ra>
